<compile_context>
chip_gen: v7x
topology: tpu7x:2x2x1
jax: 0.10.0
libtpu: 0.0.40
codegen_flags: <defaults>
</compile_context>

<pallas_src>
import jax
import jax.numpy as jnp
from jax.experimental import pallas as pl
from jax.experimental.pallas import tpu as pltpu

# ---------------- model hyper-params (deterministic, synthetic) -------------
VOCAB_SIZE      = 60          # base vocab
NUM_MEM_TOKENS  = 4           # rmt memory tokens appended to the vocab
V_EXT           = VOCAB_SIZE + NUM_MEM_TOKENS   # extended vocab (64)
HIDDEN          = 32          # embedding dim
INPUT_SIZE      = 16          # per-segment sequence length
BATCH           = 2
N_SEGMENTS      = 4           # rmt_config['max_n_segments'] — batched per call
PAD_TOKEN_ID    = 0
CLS_TOKEN_ID    = 1
SEP_TOKEN_ID    = 2

# Pad the one-hot contraction axis to a full MXU/vreg lane width (64 -> 128
# zero rows); the hidden axis stays at its true width H so the kernel writes
# only useful bytes (no padded slab + XLA slice-copy afterwards).
V_PAD = 128


# ------------------------------ Pallas kernel -------------------------------
def _rmt_embed_gather_kernel(ids_ref,   # VMEM (T, 1)     int32 : all segments' ids, sublane-major
                             emb_ref,   # VMEM (V_PAD, H) f32   : zero-padded embedding table
                             out_ref):  # VMEM (T, H)     f32   : inputs_embeds, flat
    ids = ids_ref[...]                                  # (T, 1)   — already a column, no reshape
    emb = emb_ref[...]                                  # (V_PAD, H)
    T = ids.shape[0]
    V = emb.shape[0]

    # inputs_embeds = embeddings(input_ids): one-hot gather on the MXU.
    # ids arrive clamped to [0, V_EXT) by the wrapper (jnp.take clip semantics),
    # so every row of `onehot` has exactly one 1.
    iota = jax.lax.broadcasted_iota(jnp.int32, (T, V), 1)
    onehot = (ids == iota).astype(jnp.float32)          # (T, V_PAD), pure VPU broadcast compare

    # Pin precision: the MXU is bf16-native on v5e/v6e/v7x; HIGHEST forces an
    # exact (multi-pass) f32 contraction so the 0/1 gather is bit-exact.
    out_ref[...] = jnp.dot(onehot, emb,
                           preferred_element_type=jnp.float32,
                           precision=jax.lax.Precision.HIGHEST)


# ------------------------------- wrapper -------------------------------------
def rmt_prepare_segments(input_ids, emb_table, pad_token_id):
    """Per-segment RMT preparation; ALL segments in one un-gridded pallas_call.

    input_ids : (N_SEG, B, S) int32 — stacked segments (from pad_and_segment)
    emb_table : (V_EXT, H)    f32   — extended word-embedding table
    Returns (inputs_embeds (N_SEG,B,S,H), attention_mask (N_SEG,B,S),
             token_type_ids (N_SEG,B,S), memory (B,M,H)).
    """
    n_seg, B, S = input_ids.shape
    V, H = emb_table.shape
    T = n_seg * B * S                                   # 4*2*16 = 128 tokens total

    # Pre-flatten ids to a sublane-major (T, 1) column (kernel does no reshape)
    # and clamp like jnp.take's clip mode so OOB ids can't yield zero rows.
    ids_col = jnp.clip(input_ids.reshape(T, 1), 0, V - 1).astype(jnp.int32)

    # One-time zero-pad of the table on the contraction axis only: (V_PAD, H).
    emb_padded = jnp.zeros((V_PAD, H), jnp.float32).at[:V, :].set(emb_table)

    # Single invocation: no grid, full arrays resident in VMEM (≈ 0.5 KiB ids
    # + 16 KiB table + 16 KiB output).  With no grid there is nothing to
    # multi-buffer, so the Buffered(1)-on-invariant-table concern is moot.
    embeds_flat = pl.pallas_call(
        _rmt_embed_gather_kernel,
        out_shape=jax.ShapeDtypeStruct((T, H), jnp.float32),
        in_specs=[
            pl.BlockSpec(memory_space=pltpu.MemorySpace.VMEM),   # ids column
            pl.BlockSpec(memory_space=pltpu.MemorySpace.VMEM),   # padded table
        ],
        out_specs=pl.BlockSpec(memory_space=pltpu.MemorySpace.VMEM),
        compiler_params=pltpu.CompilerParams(
            vmem_limit_bytes=16 * 1024 * 1024),  # explicit; tiny footprint here
    )(ids_col, emb_padded)

    # Row-major reshape back to (N_SEG, B, S, H) — metadata-only (no lane slice).
    inputs_embeds = embeds_flat.reshape(n_seg, B, S, H)

    # get_attention_mask / get_token_type_ids: trivial elementwise — fused by
    # XLA in the wrapper instead of adding tiny masked-store kernel outputs.
    attention_mask = jnp.where(input_ids == pad_token_id, 0, 1).astype(jnp.int32)
    token_type_ids = jnp.zeros_like(input_ids)

    # set_memory(): embeddings(mem_token_ids).repeat(B,1,1) — segment-invariant,
    # computed once outside the per-segment path.
    mem_rows = jax.lax.dynamic_slice_in_dim(emb_table, VOCAB_SIZE, NUM_MEM_TOKENS, 0)
    memory = jnp.broadcast_to(mem_rows[None], (B, NUM_MEM_TOKENS, H))

    return inputs_embeds, attention_mask, token_type_ids, memory


# ------------------------------- host glue ----------------------------------
def build_segment_ids(key):
    """Builds N_SEGMENTS RMT segments per batch element:
    [CLS] [mem_0 .. mem_{M-1}] content... [SEP] [PAD]...   (length = INPUT_SIZE)
    Mirrors extend_word_embeddings / pad_add_special_tokens layout.
    """
    # TODO(synk): pad_and_segment's ragged, data-dependent splitting loops stay on host.
    mem_ids = jnp.arange(VOCAB_SIZE, VOCAB_SIZE + NUM_MEM_TOKENS, dtype=jnp.int32)
    n_content = INPUT_SIZE - NUM_MEM_TOKENS - 2  # minus CLS and SEP
    segs = []
    for seg in range(N_SEGMENTS):
        rows = []
        for b in range(BATCH):
            kb = jax.random.fold_in(jax.random.fold_in(key, seg), b)
            content_len = max(n_content - b - seg, 1)   # ragged rows -> some PADs
            content = jax.random.randint(kb, (content_len,), 3, VOCAB_SIZE,
                                         dtype=jnp.int32)
            row = jnp.concatenate([
                jnp.asarray([CLS_TOKEN_ID], dtype=jnp.int32),
                mem_ids,
                content,
                jnp.asarray([SEP_TOKEN_ID], dtype=jnp.int32),
                jnp.full((n_content - content_len,), PAD_TOKEN_ID, dtype=jnp.int32),
            ])
            rows.append(row)
        segs.append(jnp.stack(rows))
    return jnp.stack(segs)  # (N_SEG, B, S)


if __name__ == "__main__":
    key = jax.random.PRNGKey(0)
    k_emb, k_ids = jax.random.split(key)

    # Deterministic synthetic extended word-embedding table (V_ext, H).
    emb_table = jax.random.normal(k_emb, (V_EXT, HIDDEN), dtype=jnp.float32) * 0.02

    input_ids = build_segment_ids(k_ids)   # (N_SEG, B, S) int32

    embeds, attn_mask, token_type_ids, memory = jax.block_until_ready(
        rmt_prepare_segments(input_ids, emb_table, PAD_TOKEN_ID)
    )

    # ----------------------- pure-JAX reference check -----------------------
    ref_embeds = jnp.take(emb_table, input_ids, axis=0)                        # (N,B,S,H)
    ref_mask = jnp.where(input_ids == PAD_TOKEN_ID, 0, 1).astype(jnp.int32)    # (N,B,S)
    ref_ttids = jnp.zeros_like(input_ids)                                      # (N,B,S)
    mem_token_ids = jnp.arange(VOCAB_SIZE, VOCAB_SIZE + NUM_MEM_TOKENS)
    ref_memory = jnp.broadcast_to(jnp.take(emb_table, mem_token_ids, axis=0)[None],
                                  (BATCH, NUM_MEM_TOKENS, HIDDEN))

    assert embeds.shape == (N_SEGMENTS, BATCH, INPUT_SIZE, HIDDEN)
    assert jnp.allclose(embeds, ref_embeds, atol=1e-6), "inputs_embeds mismatch"
    assert jnp.array_equal(attn_mask, ref_mask), "attention_mask mismatch"
    assert jnp.array_equal(token_type_ids, ref_ttids), "token_type_ids mismatch"
    assert jnp.allclose(memory, ref_memory, atol=1e-6), "memory mismatch"

    print("KERNEL_OK")
</pallas_src>

<mosaic_0001>
module attributes {stable_mosaic.version = 11 : i64} {
  func.func @_rmt_embed_gather_kernel(%arg0: memref<128x1xi32, #tpu.memory_space<vmem>>, %arg1: memref<128x32xf32, #tpu.memory_space<vmem>>, %arg2: memref<128x32xf32, #tpu.memory_space<vmem>>) attributes {dimension_semantics = [], scalar_prefetch = 0 : i64, scratch_operands = 0 : i64, tpu.core_type = #tpu.core_type<tc>} {
    %c0 = arith.constant 0 : index
    %c0_0 = arith.constant 0 : index
    %0 = vector.load %arg0[%c0, %c0_0] : memref<128x1xi32, #tpu.memory_space<vmem>>, vector<128x1xi32>
    %c0_1 = arith.constant 0 : index
    %c0_2 = arith.constant 0 : index
    %1 = vector.load %arg1[%c0_1, %c0_2] : memref<128x32xf32, #tpu.memory_space<vmem>>, vector<128x32xf32>
    %2 = tpu.iota {dimensions = array<i32: 1>} : vector<128x128xi32>
    %3 = vector.broadcast %0 : vector<128x1xi32> to vector<128x128xi32>
    %4 = arith.cmpi eq, %3, %2 : vector<128x128xi32>
    %5 = arith.extui %4 : vector<128x128xi1> to vector<128x128xi32>
    %6 = arith.sitofp %5 : vector<128x128xi32> to vector<128x128xf32>
    %cst = arith.constant dense<0.000000e+00> : vector<128x32xf32>
    %7 = tpu.matmul %6, %1, %cst {dimension_numbers = #tpu.dot_dimension_numbers<[1], [0], [0], [1], [0, 0, 1, 1], [], []>, precision = #tpu.contract_precision<fp32>} : vector<128x128xf32>, vector<128x32xf32>, vector<128x32xf32> -> vector<128x32xf32>
    %c0_3 = arith.constant 0 : index
    %c0_4 = arith.constant 0 : index
    %8 = vector.load %arg2[%c0_3, %c0_4] : memref<128x32xf32, #tpu.memory_space<vmem>>, vector<128x32xf32>
    tpu.vector_store %arg2[%c0_3, %c0_4], %7 {strides = array<i32>} : memref<128x32xf32, #tpu.memory_space<vmem>>, vector<128x32xf32>,
    return
  }
}

</mosaic_0001>

<bundles_post_ra>
// kernel: tpu_custom_call.1
= control target key start
LH: loop header
LB: loop body
LE: loop exit
PB: predicated region body
PF: predicated region fallthrough
CT: control target
= control target key end

     0   :  { %v2317_v0 = vmov 0   ;;  %s3168_s0 = inlined_call_operand.vmem [shape: s32[128,1], index: 0, kind: input, shape index: {}]   ;;  %s3169_s1 = inlined_call_operand.vmem [shape: f32[128,32], index: 1, kind: input, shape index: {}]   ;;  %s3170_s2 = inlined_call_operand.vmem [shape: f32[128,32], index: 2, kind: output, shape index: {}]  }
   0x1   :  { %2316 = vset.pattern.permute.xlu1 %v2317_v0  ;;  %2315 = vset.pattern.permute.xlu0 %v2317_v0  ;;  %v13_v1 = vld [vmem:[%s3168_s0 + $0x10] sm:$0xff]  ;;  %v11_v2 = vld [vmem:[%s3168_s0] sm:$0xff]  ;;  %v14_v3 = vld [vmem:[%s3168_s0 + $0x18] sm:$0xff] }
   0x2   :  { %52 = vperm.xlu1 %2316, %v13_v1   ;;  %46 = vperm.xlu0 %2315, %v11_v2   ;;  %v12_v4 = vld [vmem:[%s3168_s0 + $0x8] sm:$0xff]  ;;  %v15_v6 = vld [vmem:[%s3168_s0 + $0x20] sm:$0xff]  ;;  %v29_v11 = vld [vmem:[%s3169_s1 + $0x10] sm:$0xff] }
   0x3   :  { %v16_v5 = vld [vmem:[%s3168_s0 + $0x28] sm:$0xff]  ;;  %v27_v7 = vld [vmem:[%s3169_s1] sm:$0xff]  ;;  %v30_v12 = vld [vmem:[%s3169_s1 + $0x18] sm:$0xff]  ;;  %v148_v14 = vand.u32 4294901760, %v29_v11 }
   0x4   :  { %v2359_v8 = vld [vmem:[%s3169_s1 + $0x8] sm:$0xff]  ;;  %v142_v9 = vand.u32 4294901760, %v27_v7  ;;  %v31_v13 = vld [vmem:[%s3169_s1 + $0x20] sm:$0xff]  ;;  %v151_v15 = vand.u32 4294901760, %v30_v12  ;;  %v33_v21 = vld [vmem:[%s3169_s1 + $0x30] sm:$0xff] }
   0x5   :  { %v145_v10 = vand.u32 4294901760, %v2359_v8  ;;  %v32_v16 = vld [vmem:[%s3169_s1 + $0x28] sm:$0xff]  ;;  %v154_v18 = vand.u32 4294901760, %v31_v13  ;;  %v34_v22 = vld [vmem:[%s3169_s1 + $0x38] sm:$0xff]  ;;  %v17_v24 = vld [vmem:[%s3168_s0 + $0x30] sm:$0xff]  ;;  %v160_v28 = vand.u32 4294901760, %v33_v21  ;;  %v2423_v33 = vsub.f32 %v29_v11, %v148_v14 }
   0x6   :  { %55 = vperm.xlu1 %2316, %v14_v3   ;;  %49 = vperm.xlu0 %2315, %v12_v4   ;;  %v157_v19 = vand.u32 4294901760, %v32_v16  ;;  %v2376_v20 = vpack.c.bf16 %v151_v15, %v148_v14  ;;  %v18_v23 = vld [vmem:[%s3168_s0 + $0x38] sm:$0xff]  ;;  %v2397_v25 = vld [vmem:[%s3169_s1 + $0x40] sm:$0xff]  ;;  %v2402_v26 = vld [vmem:[%s3169_s1 + $0x48] sm:$0xff]  ;;  %v163_v29 = vand.u32 4294901760, %v34_v22  ;;  %v2433_v38 = vsub.f32 %v30_v12, %v151_v15 }
   0x7   :  { %v2374_v17 = vpack.c.bf16 %v145_v10, %v142_v9  ;;  %v2411_v30 = vld [vmem:[%s3169_s1 + $0x50] sm:$0xff]  ;;  %v2416_v31 = vld [vmem:[%s3169_s1 + $0x58] sm:$0xff]  ;;  %v2421_v32 = vld [vmem:[%s3169_s1 + $0x60] sm:$0xff]  ;;  %v166_v36 = vand.u32 4294901760, %v2397_v25  ;;  %v169_v37 = vand.u32 4294901760, %v2402_v26  ;;  %v2435_v39 = vsub.f32 %v31_v13, %v154_v18 }
   0x8   :  { %v2406_v27 = vpack.c.bf16 %v157_v19, %v154_v18  ;;  %v20_v34 = vld [vmem:[%s3168_s0 + $0x48] sm:$0xff]  ;;  %v19_v35 = vld [vmem:[%s3168_s0 + $0x40] sm:$0xff]  ;;  %v172_v40 = vand.u32 4294901760, %v2411_v30  ;;  %v399_v41 = vand.u32 4294901760, %v2423_v33  ;;  %v2441_v42 = vsub.f32 %v32_v16, %v157_v19  ;;  %v22_v52 = vld [vmem:[%s3168_s0 + $0x58] sm:$0xff] }
   0x9   :  { %2137 = vmatprep.subr.bf16.mxu0 %v2374_v17  ;;  %2041 = vmatprep.subr.bf16.mxu1 %v2374_v17  ;;  %v2445_v43 = vpack.c.bf16 %v163_v29, %v160_v28  ;;  %v175_v44 = vand.u32 4294901760, %v2416_v31  ;;  %v178_v45 = vand.u32 4294901760, %v2421_v32  ;;  %v406_v46 = vand.u32 4294901760, %v2433_v38  ;;  %v2453_v47 = vld [vmem:[%s3169_s1 + $0x68] sm:$0xff]  ;;  %v21_v53 = vld [vmem:[%s3168_s0 + $0x50] sm:$0xff] }
   0xa   :  { %61 = vperm.xlu1 %2316, %v16_v5   ;;  %58 = vperm.xlu0 %2315, %v15_v6   ;;  %v2455_v48 = vsub.f32 %v27_v7, %v142_v9  ;;  %v400_v49 = vsub.f32 %v2423_v33, %v399_v41  ;;  %v413_v50 = vand.u32 4294901760, %v2435_v39  ;;  %v420_v51 = vand.u32 4294901760, %v2441_v42  ;;  %v2471_v55 = vld [vmem:[%s3169_s1 + $0x70] sm:$0xff]  ;;  %v24_v7 = vld [vmem:[%s3168_s0 + $0x68] sm:$0xff]  ;;  %v2503_v9 = vld [vmem:[%s3169_s1 + $0x78] sm:$0xff] }
   0xb   :  { %2139 = vmatpush3.bf16.msra.mxu0 %v2374_v17  ;;  %2043 = vmatpush3.bf16.msra.mxu1 %v2374_v17  ;;  %v2466_v54 = vpack.c.bf16 %v169_v37, %v166_v36  ;;  %v2474_v56 = vsub.f32 %v2359_v8, %v145_v10  ;;  %v2476_v57 = vpack.c.bf16 %v406_v46, %v399_v41  ;;  %v181_v63 = vand.u32 4294901760, %v2453_v47  ;;  %v23_v8 = vld [vmem:[%s3168_s0 + $0x60] sm:$0xff] }
   0xc   :  { %2141 = vmatprep.subr.bf16.mxu0 %v2376_v20  ;;  %2045 = vmatprep.subr.bf16.mxu1 %v2376_v20  ;;  %v407_v58 = vsub.f32 %v2433_v38, %v406_v46  ;;  %v401_v59 = vand.u32 4294901760, %v400_v49  ;;  %v2481_v60 = vpack.c.bf16 %v420_v51, %v413_v50  ;;  %v414_v61 = vsub.f32 %v2435_v39, %v413_v50 }
   0xd   :  { %v421_v62 = vsub.f32 %v2441_v42, %v420_v51  ;;  %v2488_v1 = vsub.f32 %v33_v21, %v160_v28  ;;  %v2490_v2 = vsub.f32 %v34_v22, %v163_v29  ;;  %v184_v3 = vand.u32 4294901760, %v2471_v55  ;;  %v26_v29 = vld [vmem:[%s3168_s0 + $0x78] sm:$0xff] }
   0xe   :  { %67 = vperm.xlu1 %2316, %v18_v23   ;;  %64 = vperm.xlu0 %2315, %v17_v24   ;;  %v408_v0 = vand.u32 4294901760, %v407_v58  ;;  %v385_v4 = vand.u32 4294901760, %v2455_v48  ;;  %v415_v5 = vand.u32 4294901760, %v414_v61  ;;  %v2510_v13 = vsub.f32 %v2397_v25, %v166_v36 }
   0xf   :  { %2143 = vmatpush3.bf16.msra.mxu0 %v2376_v20  ;;  %2047 = vmatpush3.bf16.msra.mxu1 %v2376_v20  ;;  %v422_v6 = vand.u32 4294901760, %v421_v62  ;;  %v427_v11 = vand.u32 4294901760, %v2488_v1  ;;  %v434_v12 = vand.u32 4294901760, %v2490_v2  ;;  %v2518_v14 = vpack.c.bf16 %v175_v44, %v172_v40 }
  0x10   :  { %2145 = vmatprep.subr.bf16.mxu0 %v2406_v27  ;;  %2049 = vmatprep.subr.bf16.mxu1 %v2406_v27  ;;  %v2505_v10 = vpack.c.bf16 %v408_v0, %v401_v59  ;;  %v392_v15 = vand.u32 4294901760, %v2474_v56  ;;  %v2524_v18 = vsub.f32 %v2402_v26, %v169_v37  ;;  %v441_v23 = vand.u32 4294901760, %v2510_v13 }
  0x11   :  { %v2521_v16 = vpack.c.bf16 %v422_v6, %v415_v5  ;;  %v2528_v19 = vpack.c.bf16 %v434_v12, %v427_v11  ;;  %v428_v21 = vsub.f32 %v2488_v1, %v427_v11  ;;  %v435_v22 = vsub.f32 %v2490_v2, %v434_v12 }
  0x12   :  { %73 = vperm.xlu1 %2316, %v20_v34   ;;  %70 = vperm.xlu0 %2315, %v19_v35   ;;  %v2535_v24 = vpack.c.bf16 %v181_v63, %v178_v45  ;;  %v187_v25 = vand.u32 4294901760, %v2503_v9  ;;  %v386_v26 = vsub.f32 %v2455_v48, %v385_v4  ;;  %v448_v28 = vand.u32 4294901760, %v2524_v18  ;;  %v25_v34 = vld [vmem:[%s3168_s0 + $0x70] sm:$0xff] }
  0x13   :  { %2147 = vmatpush3.bf16.msra.mxu0 %v2406_v27  ;;  %2051 = vmatpush3.bf16.msra.mxu1 %v2406_v27  ;;  %v429_v35 = vand.u32 4294901760, %v428_v21  ;;  %v436_v36 = vand.u32 4294901760, %v435_v22  ;;  %v442_v37 = vsub.f32 %v2510_v13, %v441_v23  ;;  %v2552_v41 = vsub.f32 %v2411_v30, %v172_v40 }
  0x14   :  { %2149 = vmatprep.subr.bf16.mxu0 %v2445_v43  ;;  %2053 = vmatprep.subr.bf16.mxu1 %v2445_v43  ;;  %v2556_v46 = vpack.c.bf16 %v448_v28, %v441_v23  ;;  %v449_v49 = vsub.f32 %v2524_v18, %v448_v28  ;;  %v461_v50 = vsub.f32 %v2416_v31, %v175_v44  ;;  %v387_v62 = vand.u32 4294901760, %v386_v26 }
  0x15   :  { %v393_v51 = vsub.f32 %v2474_v56, %v392_v15  ;;  %v2565_v30 = vpack.c.bf16 %v436_v36, %v429_v35  ;;  %v443_v40 = vand.u32 4294901760, %v442_v37  ;;  %v2570_v59 = vpack.c.bf16 %v187_v25, %v184_v3 }
  0x16   :  { %79 = vperm.xlu1 %2316, %v22_v52   ;;  %76 = vperm.xlu0 %2315, %v21_v53   ;;  %v455_v52 = vand.u32 4294901760, %v2552_v41  ;;  %v450_v53 = vand.u32 4294901760, %v449_v49  ;;  %v462_v58 = vand.u32 4294901760, %v461_v50  ;;  %v468_v44 = vsub.f32 %v2421_v32, %v178_v45 }
  0x17   :  { %2151 = vmatpush3.bf16.msra.mxu0 %v2445_v43  ;;  %2055 = vmatpush3.bf16.msra.mxu1 %v2445_v43  ;;  %v475_v61 = vsub.f32 %v2453_v47, %v181_v63  ;;  %v482_v21 = vsub.f32 %v2471_v55, %v184_v3  ;;  %v2594_v22 = vpack.c.bf16 %v392_v15, %v385_v4 }
  0x18   :  { %2153 = vmatprep.subr.bf16.mxu0 %v2466_v54  ;;  %2057 = vmatprep.subr.bf16.mxu1 %v2466_v54  ;;  %v456_v31 = vsub.f32 %v2552_v41, %v455_v52  ;;  %v2579_v0 = vpack.c.bf16 %v450_v53, %v443_v40  ;;  %v2581_v5 = vpack.c.bf16 %v462_v58, %v455_v52  ;;  %v469_v11 = vand.u32 4294901760, %v468_v44 }
  0x19   :  { %v463_v6 = vsub.f32 %v461_v50, %v462_v58  ;;  %v476_v32 = vand.u32 4294901760, %v475_v61  ;;  %v489_v26 = vsub.f32 %v2503_v9, %v187_v25  ;;  %v483_v3 = vand.u32 4294901760, %v482_v21 }
  0x1a   :  { %85 = vperm.xlu1 %2316, %v24_v7   ;;  %82 = vperm.xlu0 %2315, %v23_v8   ;;  %v394_v7 = vand.u32 4294901760, %v393_v51  ;;  %v457_v8 = vand.u32 4294901760, %v456_v31  ;;  %v470_v63 = vsub.f32 %v468_v44, %v469_v11  ;;  %v2615_v49 = vpack.c.bf16 %v2474_v56, %v2455_v48 }
  0x1b   :  { %2155 = vmatpush3.bf16.msra.mxu0 %v2466_v54  ;;  %2059 = vmatpush3.bf16.msra.mxu1 %v2466_v54  ;;  %v464_v45 = vand.u32 4294901760, %v463_v6  ;;  %v2585_v47 = vpack.c.bf16 %v476_v32, %v469_v11  ;;  %v477_v12 = vsub.f32 %v475_v61, %v476_v32  ;;  %v484_v36 = vsub.f32 %v482_v21, %v483_v3 }
  0x1c   :  { %2157 = vmatprep.subr.bf16.mxu0 %v2518_v14  ;;  %2061 = vmatprep.subr.bf16.mxu1 %v2518_v14  ;;  %v2601_v28 = vpack.c.bf16 %v394_v7, %v387_v62  ;;  %v2619_v51 = vpack.c.bf16 %v2433_v38, %v2423_v33  ;;  %v2623_v40 = vpack.c.bf16 %v2441_v42, %v2435_v39  ;;  %v43_v33 = vlaneseq }
  0x1d   :  { %v2596_v23 = vpack.c.bf16 %v464_v45, %v457_v8  ;;  %v478_v55 = vand.u32 4294901760, %v477_v12  ;;  %v485_v15 = vand.u32 4294901760, %v484_v36  ;;  %v2627_v52 = vpack.c.bf16 %v2490_v2, %v2488_v1 }
  0x1e   :  { %91 = vperm.xlu1 %2316, %v26_v29   ;;  %88 = vperm.xlu0 %2315, %v25_v34   ;;  %v471_v29 = vand.u32 4294901760, %v470_v63  ;;  %v490_v34 = vand.u32 4294901760, %v489_v26  ;;  %v2631_v53 = vpack.c.bf16 %v2524_v18, %v2510_v13  ;;  %v2634_v58 = vpack.c.bf16 %v461_v50, %v2552_v41 }
  0x1f   :  { %2159 = vmatpush3.bf16.msra.mxu0 %v2518_v14  ;;  %2063 = vmatpush3.bf16.msra.mxu1 %v2518_v14  ;;  %v2636_v48 = vpack.c.bf16 %v475_v61, %v468_v44  ;;  %v2638_v56 = vpack.c.bf16 %v489_v26, %v482_v21  ;;  %v2640_v38 = vand.u32 127, %v43_v33  ;;  %v3171_v1 = vmov 0.0  }
  0x20   :  { %2161 = vmatprep.subr.bf16.mxu0 %v2535_v24  ;;  %2065 = vmatprep.subr.bf16.mxu1 %v2535_v24  ;;  %v2603_v35 = vpack.c.bf16 %v478_v55, %v471_v29  ;;  %v2607_v4 = vpack.c.bf16 %v490_v34, %v483_v3  ;;  %v491_v9 = vsub.f32 %v489_v26, %v490_v34 }
  0x22   :  { %v492_v25 = vand.u32 4294901760, %v491_v9 }
  0x23   :  { %2163 = vmatpush3.bf16.msra.mxu0 %v2535_v24  ;;  %2067 = vmatpush3.bf16.msra.mxu1 %v2535_v24 }
  0x24   :  { %2165 = vmatprep.subr.bf16.mxu0 %v2570_v59  ;;  %2069 = vmatprep.subr.bf16.mxu1 %v2570_v59  ;;  %v2611_v37 = vpack.c.bf16 %v492_v25, %v485_v15 }
  0x27   :  { %2167 = vmatpush3.bf16.msra.mxu0 %v2570_v59  ;;  %2071 = vmatpush3.bf16.msra.mxu1 %v2570_v59 }
  0x28   :  { %2169 = vmatprep.subr.bf16.mxu0 %v2594_v22  ;;  %2073 = vmatprep.subr.bf16.mxu1 %v2601_v28 }
  0x81   :  { %v2642_v39 = vpop.permute.xlu1 %52  ;;  %v2644_v42 = vpop.permute.xlu0 %46 }
  0x82   :  { %vm95_vm0 = vcmp.eq.s32.totalorder %v2642_v39, %v2640_v38  ;;  %vm93_vm1 = vcmp.eq.s32.totalorder %v2644_v42, %v2640_v38 }
  0x83   :  { %v1450_v2 = vsel %vm95_vm0, 1.0, %v3171_v1  ;;  %v1448_v13 = vsel %vm93_vm1, 1.0, %v3171_v1 }
  0x84   :  { %v2658_v18 = vsub.f32 %v1450_v2, %v1450_v2  ;;  %v2660_v41 = vsub.f32 %v1448_v13, %v1448_v13 }
  0x85   :  { %v2662_v50 = vpop.permute.xlu1 %55  ;;  %v2664_v31 = vpop.permute.xlu0 %49 }
  0x86   :  { %vm96_vm2 = vcmp.eq.s32.totalorder %v2662_v50, %v2640_v38  ;;  %vm94_vm3 = vcmp.eq.s32.totalorder %v2664_v31, %v2640_v38  ;;  %v224_v44 = vand.u32 4294901760, %v2660_v41  ;;  %v244_v6 = vand.u32 4294901760, %v2658_v18 }
  0x87   :  { %v1451_v61 = vsel %vm96_vm2, 1.0, %v3171_v1  ;;  %v1449_v62 = vsel %vm94_vm3, 1.0, %v3171_v1 }
  0x88   :  { %v2680_v7 = vsub.f32 %v1451_v61, %v1451_v61  ;;  %v2682_v8 = vsub.f32 %v1449_v62, %v1449_v62  ;;  %1904 = vmatprep.mubr.f32.mxu0 %v224_v44  ;;  %v225_v11 = vsub.f32 %v2660_v41, %v224_v44  ;;  %v245_v55 = vsub.f32 %v2658_v18, %v244_v6 }
  0x89   :  { %v2685_v32 = vpop.permute.xlu1 %61  ;;  %v2687_v45 = vpop.permute.xlu0 %58 }
  0x8a   :  { %vm98_vm4 = vcmp.eq.s32.totalorder %v2685_v32, %v2640_v38  ;;  %vm97_vm5 = vcmp.eq.s32.totalorder %v2687_v45, %v2640_v38  ;;  %v226_v63 = vand.u32 4294901760, %v225_v11  ;;  %v234_v12 = vand.u32 4294901760, %v2682_v8 }
  0x8b   :  { %v1453_v21 = vsel %vm98_vm4, 1.0, %v3171_v1  ;;  %v1452_v26 = vsel %vm97_vm5, 1.0, %v3171_v1  ;;  %v254_v29 = vand.u32 4294901760, %v2680_v7  ;;  %v246_v44 = vand.u32 4294901760, %v245_v55 }
  0x8c   :  { %v2704_v3 = vsub.f32 %v1453_v21, %v1453_v21  ;;  %v2706_v34 = vsub.f32 %v1452_v26, %v1452_v26  ;;  %1736 = vmatprep.mubr.f32.mxu1 %v226_v63  ;;  %1905 = vmatmul.mubr.f32.vlgmr.msra.gmra.mrb[0].mxu0 %v234_v12  ;;  %v235_v36 = vsub.f32 %v2682_v8, %v234_v12 }
  0x8d   :  { %v2709_v9 = vpop.permute.xlu1 %67  ;;  %1907 = vmatprep.mubr.f32.mxu0 %v244_v6  ;;  %2171 = vmatpush3.bf16.msra.mxu0 %v2594_v22  ;;  %v2712_v15 = vpop.permute.xlu0 %64  ;;  %v255_v25 = vsub.f32 %v2680_v7, %v254_v29 }
  0x8e   :  { %vm100_vm6 = vcmp.eq.s32.totalorder %v2709_v9, %v2640_v38  ;;  %vm99_vm7 = vcmp.eq.s32.totalorder %v2712_v15, %v2640_v38  ;;  %v236_v33 = vand.u32 4294901760, %v235_v36  ;;  %2173 = vmatprep.subr.bf16.mxu0 %v2476_v57  ;;  %v264_v2 = vand.u32 4294901760, %v2706_v34 }
  0x8f   :  { %v1455_v22 = vsel %vm100_vm6, 1.0, %v3171_v1  ;;  %v1454_v13 = vsel %vm99_vm7, 1.0, %v3171_v1  ;;  %v274_v61 = vand.u32 4294901760, %v2704_v3  ;;  %v256_v21 = vand.u32 4294901760, %v255_v25 }
  0x90   :  { %v2730_v62 = vsub.f32 %v1455_v22, %v1455_v22  ;;  %v2732_v6 = vsub.f32 %v1454_v13, %v1454_v13  ;;  %1737 = vmatmul.mubr.f32.vlgmr.msra.gmra.mrb[0].mxu1 %v236_v33  ;;  %1908 = vmatmul.mubr.f32.gmra.mrb[2].mxu0 %v254_v29  ;;  %v265_v11 = vsub.f32 %v2706_v34, %v264_v2 }
  0x91   :  { %2075 = vmatpush3.bf16.msra.mxu1 %v2601_v28  ;;  %v2736_v63 = vpop.permute.xlu1 %73  ;;  %1739 = vmatprep.mubr.f32.mxu1 %v246_v44  ;;  %v2738_v12 = vpop.permute.xlu0 %70  ;;  %v275_v26 = vsub.f32 %v2704_v3, %v274_v61 }
  0x92   :  { %3178 = vst [vmem:[#allocation2_spill] sm:$0xff] %v2730_v62  ;;  %3179 = vst [vmem:[#allocation3_spill] sm:$0xff] %v2732_v6  ;;  %vm102_vm8 = vcmp.eq.s32.totalorder %v2736_v63, %v2640_v38  ;;  %1910 = vmatprep.mubr.f32.mxu0 %v264_v2  ;;  %2175 = vmatpush3.bf16.msra.mxu0 %v2476_v57  ;;  %vm101_vm9 = vcmp.eq.s32.totalorder %v2738_v12, %v2640_v38  ;;  %v266_v29 = vand.u32 4294901760, %v265_v11 }
  0x93   :  { %v284_v28 = vand.u32 4294901760, %v2732_v6  ;;  %v1457_v55 = vsel %vm102_vm8, 1.0, %v3171_v1  ;;  %v1456_v36 = vsel %vm101_vm9, 1.0, %v3171_v1  ;;  %2077 = vmatprep.subr.bf16.mxu1 %v2505_v10  ;;  %2177 = vmatprep.subr.bf16.mxu0 %v2481_v60  ;;  %v294_v57 = vand.u32 4294901760, %v2730_v62 }
  0x94   :  { %v2758_v25 = vsub.f32 %v1457_v55, %v1457_v55  ;;  %v2760_v33 = vsub.f32 %v1456_v36, %v1456_v36  ;;  %1740 = vmatmul.mubr.f32.gmra.mrb[2].mxu1 %v256_v21  ;;  %1911 = vmatmul.mubr.f32.gmra.mrb[4].mxu0 %v274_v61  ;;  %v276_v44 = vand.u32 4294901760, %v275_v26 }
  0x95   :  { %v285_v2 = vsub.f32 %v2732_v6, %v284_v28  ;;  %2079 = vmatpush3.bf16.msra.mxu1 %v2505_v10  ;;  %v2764_v22 = vpop.permute.xlu1 %79  ;;  %1742 = vmatprep.mubr.f32.mxu1 %v266_v29  ;;  %v2766_v13 = vpop.permute.xlu0 %76  ;;  %v295_v11 = vsub.f32 %v2730_v62, %v294_v57 }
  0x96   :  { %3180 = vst [vmem:[#allocation4_spill] sm:$0xff] %v2758_v25  ;;  %3181 = vst [vmem:[#allocation5_spill] sm:$0xff] %v2760_v33  ;;  %vm104_vm10 = vcmp.eq.s32.totalorder %v2764_v22, %v2640_v38  ;;  %1913 = vmatprep.mubr.f32.mxu0 %v284_v28  ;;  %2179 = vmatpush3.bf16.msra.mxu0 %v2481_v60  ;;  %vm103_vm11 = vcmp.eq.s32.totalorder %v2766_v13, %v2640_v38  ;;  %v304_v10 = vand.u32 4294901760, %v2760_v33 }
  0x97   :  { %v286_v61 = vand.u32 4294901760, %v285_v2  ;;  %v1459_v21 = vsel %vm104_vm10, 1.0, %v3171_v1  ;;  %v1458_v26 = vsel %vm103_vm11, 1.0, %v3171_v1  ;;  %2081 = vmatprep.subr.bf16.mxu1 %v2521_v16  ;;  %2181 = vmatprep.subr.bf16.mxu0 %v2528_v19  ;;  %v314_v60 = vand.u32 4294901760, %v2758_v25 }
  0x98   :  { %v2786_v29 = vsub.f32 %v1459_v21, %v1459_v21  ;;  %v2788_v28 = vsub.f32 %v1458_v26, %v1458_v26  ;;  %1743 = vmatmul.mubr.f32.gmra.mrb[4].mxu1 %v276_v44  ;;  %1914 = vmatmul.mubr.f32.gmra.mrb[6].mxu0 %v294_v57  ;;  %v305_v55 = vsub.f32 %v2760_v33, %v304_v10  ;;  %v296_v1 = vand.u32 4294901760, %v295_v11 }
  0x99   :  { %2083 = vmatpush3.bf16.msra.mxu1 %v2521_v16  ;;  %v2792_v36 = vpop.permute.xlu1 %85  ;;  %1745 = vmatprep.mubr.f32.mxu1 %v286_v61  ;;  %v2794_v2 = vpop.permute.xlu0 %82  ;;  %v315_v62 = vsub.f32 %v2758_v25, %v314_v60  ;;  %v3183_v44 = vmov 0.0  }
  0x9a   :  { %3182 = vst [vmem:[#allocation6_spill] sm:$0xff] %v2786_v29  ;;  %vm106_vm12 = vcmp.eq.s32.totalorder %v2792_v36, %v2640_v38  ;;  %1916 = vmatprep.mubr.f32.mxu0 %v304_v10  ;;  %2183 = vmatpush3.bf16.msra.mxu0 %v2528_v19  ;;  %vm105_vm13 = vcmp.eq.s32.totalorder %v2794_v2, %v2640_v38  ;;  %v306_v57 = vand.u32 4294901760, %v305_v55  ;;  %v324_v16 = vand.u32 4294901760, %v2788_v28 }
  0x9b   :  { %v1461_v61 = vsel %vm106_vm12, 1.0, %v3183_v44  ;;  %v1460_v11 = vsel %vm105_vm13, 1.0, %v3183_v44  ;;  %2085 = vmatprep.subr.bf16.mxu1 %v2565_v30  ;;  %2185 = vmatprep.subr.bf16.mxu0 %v2556_v46  ;;  %v334_v19 = vand.u32 4294901760, %v2786_v29  ;;  %v316_v33 = vand.u32 4294901760, %v315_v62 }
  0x9c   :  { %v2814_v10 = vsub.f32 %v1461_v61, %v1461_v61  ;;  %v2816_v21 = vsub.f32 %v1460_v11, %v1460_v11  ;;  %1746 = vmatmul.mubr.f32.gmra.mrb[6].mxu1 %v296_v1  ;;  %1917 = vmatmul.mubr.f32.gmra.mrb[8].mxu0 %v314_v60  ;;  %v325_v26 = vsub.f32 %v2788_v28, %v324_v16 }
  0x9d   :  { %2087 = vmatpush3.bf16.msra.mxu1 %v2565_v30  ;;  %v2820_v55 = vpop.permute.xlu1 %91  ;;  %1748 = vmatprep.mubr.f32.mxu1 %v306_v57  ;;  %v2822_v25 = vpop.permute.xlu0 %88  ;;  %v335_v6 = vsub.f32 %v2786_v29, %v334_v19 }
  0x9e   :  { %vm108_vm14 = vcmp.eq.s32.totalorder %v2820_v55, %v2640_v38  ;;  %1919 = vmatprep.mubr.f32.mxu0 %v324_v16  ;;  %2187 = vmatpush3.bf16.msra.mxu0 %v2556_v46  ;;  %vm107_vm15 = vcmp.eq.s32.totalorder %v2822_v25, %v2640_v38  ;;  %v326_v1 = vand.u32 4294901760, %v325_v26  ;;  %v344_v30 = vand.u32 4294901760, %v2816_v21 }
  0x9f   :  { %v1463_v60 = vsel %vm108_vm14, 1.0, %v3183_v44  ;;  %v1462_v62 = vsel %vm107_vm15, 1.0, %v3183_v44  ;;  %2089 = vmatprep.subr.bf16.mxu1 %v2579_v0  ;;  %2189 = vmatprep.subr.bf16.mxu0 %v2581_v5  ;;  %v354_v46 = vand.u32 4294901760, %v2814_v10  ;;  %v336_v11 = vand.u32 4294901760, %v335_v6 }
  0xa0   :  { %v2842_v57 = vsub.f32 %v1463_v60, %v1463_v60  ;;  %v2844_v16 = vsub.f32 %v1462_v62, %v1462_v62  ;;  %1749 = vmatmul.mubr.f32.gmra.mrb[8].mxu1 %v316_v33  ;;  %1920 = vmatmul.mubr.f32.gmra.mrb[10].mxu0 %v334_v19  ;;  %v345_v61 = vsub.f32 %v2816_v21, %v344_v30 }
  0xa1   :  { %2091 = vmatpush3.bf16.msra.mxu1 %v2579_v0  ;;  %1751 = vmatprep.mubr.f32.mxu1 %v326_v1  ;;  %v355_v29 = vsub.f32 %v2814_v10, %v354_v46 }
  0xa2   :  { %1922 = vmatprep.mubr.f32.mxu0 %v344_v30  ;;  %2191 = vmatpush3.bf16.msra.mxu0 %v2581_v5  ;;  %v346_v44 = vand.u32 4294901760, %v345_v61  ;;  %v364_v26 = vand.u32 4294901760, %v2844_v16  ;;  %v374_v60 = vand.u32 4294901760, %v2842_v57 }
  0xa3   :  { %2093 = vmatprep.subr.bf16.mxu1 %v2596_v23  ;;  %2193 = vmatprep.subr.bf16.mxu0 %v2585_v47  ;;  %v356_v5 = vand.u32 4294901760, %v355_v29 }
  0xa4   :  { %1752 = vmatmul.mubr.f32.gmra.mrb[10].mxu1 %v336_v11  ;;  %1923 = vmatmul.mubr.f32.gmra.mrb[12].mxu0 %v354_v46  ;;  %v365_v0 = vsub.f32 %v2844_v16, %v364_v26  ;;  %v375_v33 = vsub.f32 %v2842_v57, %v374_v60 }
  0xa5   :  { %2095 = vmatpush3.bf16.msra.mxu1 %v2596_v23  ;;  %1754 = vmatprep.mubr.f32.mxu1 %v346_v44  ;;  %v2319_v23 = vmov 1.0  }
  0xa6   :  { %1925 = vmatprep.mubr.f32.mxu0 %v364_v26  ;;  %2195 = vmatpush3.bf16.msra.mxu0 %v2585_v47  ;;  %v366_v6 = vand.u32 4294901760, %v365_v0  ;;  %v376_v47 = vand.u32 4294901760, %v375_v33 }
  0xa7   :  { %2097 = vmatprep.subr.bf16.mxu1 %v2603_v35  ;;  %2197 = vmatprep.subr.bf16.mxu0 %v2607_v4 }
  0xa8   :  { %1755 = vmatmul.mubr.f32.gmra.mrb[12].mxu1 %v356_v5  ;;  %1926 = vmatmul.mubr.f32.gmra.mrb[14].mxu0 %v374_v60 }
  0xa9   :  { %2099 = vmatpush3.bf16.msra.mxu1 %v2603_v35  ;;  %1757 = vmatprep.mubr.f32.mxu1 %v366_v6 }
  0xaa   :  { %2199 = vmatpush3.bf16.msra.mxu0 %v2607_v4  ;;  %1960 = vmatprep.mubr.msk.f32.mxu0 %vm93_vm1, %v2319_v23 }
  0xab   :  { %2101 = vmatprep.subr.bf16.mxu1 %v2611_v37  ;;  %2201 = vmatprep.subr.bf16.mxu0 %v2374_v17 }
  0xac   :  { %1758 = vmatmul.mubr.f32.gmra.mrb[14].mxu1 %v376_v47 }
  0xad   :  { %2103 = vmatpush3.bf16.msra.mxu1 %v2611_v37  ;;  %1961 = vmatmul.mubr.msk.f32.vlgmr.msra.gmra.mrb[0].mxu0 %vm94_vm3, %v2319_v23 }
  0xae   :  { %1792 = vmatprep.mubr.msk.f32.mxu1 %vm93_vm1, %v2319_v23  ;;  %1963 = vmatprep.mubr.msk.f32.mxu0 %vm95_vm0, %v2319_v23 }
  0xaf   :  { %2203 = vmatpush3.bf16.msra.mxu0 %v2374_v17  ;;  %2105 = vmatprep.subr.bf16.mxu1 %v2615_v49  ;;  %v3184_v17 = vld [vmem:[#allocation3_spill] sm:$0xff] }
  0xb0   :  { %1793 = vmatmul.mubr.msk.f32.vlgmr.msra.gmra.mrb[0].mxu1 %vm94_vm3, %v2319_v23  ;;  %2205 = vmatprep.subr.bf16.mxu0 %v2376_v20 }
  0xb1   :  { %2107 = vmatpush3.bf16.msra.mxu1 %v2615_v49  ;;  %1964 = vmatmul.mubr.msk.f32.gmra.mrb[2].mxu0 %vm96_vm2, %v2319_v23 }
  0xb2   :  { %1795 = vmatprep.mubr.msk.f32.mxu1 %vm95_vm0, %v2319_v23  ;;  %1966 = vmatprep.mubr.msk.f32.mxu0 %vm97_vm5, %v2319_v23 }
  0xb3   :  { %2207 = vmatpush3.bf16.msra.mxu0 %v2376_v20  ;;  %2109 = vmatprep.subr.bf16.mxu1 %v2619_v51  ;;  %v3185_v20 = vld [vmem:[#allocation2_spill] sm:$0xff] }
  0xb4   :  { %1796 = vmatmul.mubr.msk.f32.gmra.mrb[2].mxu1 %vm96_vm2, %v2319_v23  ;;  %2209 = vmatprep.subr.bf16.mxu0 %v2406_v27 }
  0xb5   :  { %2111 = vmatpush3.bf16.msra.mxu1 %v2619_v51  ;;  %1967 = vmatmul.mubr.msk.f32.gmra.mrb[4].mxu0 %vm98_vm4, %v2319_v23 }
  0xb6   :  { %1798 = vmatprep.mubr.msk.f32.mxu1 %vm97_vm5, %v2319_v23  ;;  %1969 = vmatprep.mubr.msk.f32.mxu0 %vm99_vm7, %v2319_v23 }
  0xb7   :  { %2211 = vmatpush3.bf16.msra.mxu0 %v2406_v27  ;;  %2113 = vmatprep.subr.bf16.mxu1 %v2623_v40  ;;  %v3186_v27 = vld [vmem:[#allocation5_spill] sm:$0xff] }
  0xb8   :  { %1799 = vmatmul.mubr.msk.f32.gmra.mrb[4].mxu1 %vm98_vm4, %v2319_v23  ;;  %2213 = vmatprep.subr.bf16.mxu0 %v2445_v43 }
  0xb9   :  { %2115 = vmatpush3.bf16.msra.mxu1 %v2623_v40  ;;  %1970 = vmatmul.mubr.msk.f32.gmra.mrb[6].mxu0 %vm100_vm6, %v2319_v23 }
  0xba   :  { %1801 = vmatprep.mubr.msk.f32.mxu1 %vm99_vm7, %v2319_v23  ;;  %1972 = vmatprep.mubr.msk.f32.mxu0 %vm101_vm9, %v2319_v23 }
  0xbb   :  { %2215 = vmatpush3.bf16.msra.mxu0 %v2445_v43  ;;  %2117 = vmatprep.subr.bf16.mxu1 %v2627_v52  ;;  %v3187_v43 = vld [vmem:[#allocation4_spill] sm:$0xff] }
  0xbc   :  { %1802 = vmatmul.mubr.msk.f32.gmra.mrb[6].mxu1 %vm100_vm6, %v2319_v23  ;;  %2217 = vmatprep.subr.bf16.mxu0 %v2466_v54 }
  0xbd   :  { %2119 = vmatpush3.bf16.msra.mxu1 %v2627_v52  ;;  %1973 = vmatmul.mubr.msk.f32.gmra.mrb[8].mxu0 %vm102_vm8, %v2319_v23 }
  0xbe   :  { %1804 = vmatprep.mubr.msk.f32.mxu1 %vm101_vm9, %v2319_v23  ;;  %1975 = vmatprep.mubr.msk.f32.mxu0 %vm103_vm11, %v2319_v23 }
  0xbf   :  { %2219 = vmatpush3.bf16.msra.mxu0 %v2466_v54  ;;  %2121 = vmatprep.subr.bf16.mxu1 %v2631_v53  ;;  %v3188_v54 = vld [vmem:[#allocation6_spill] sm:$0xff] }
  0xc0   :  { %1805 = vmatmul.mubr.msk.f32.gmra.mrb[8].mxu1 %vm102_vm8, %v2319_v23  ;;  %2221 = vmatprep.subr.bf16.mxu0 %v2518_v14 }
  0xc1   :  { %2123 = vmatpush3.bf16.msra.mxu1 %v2631_v53  ;;  %1976 = vmatmul.mubr.msk.f32.gmra.mrb[10].mxu0 %vm104_vm10, %v2319_v23 }
  0xc2   :  { %1807 = vmatprep.mubr.msk.f32.mxu1 %vm103_vm11, %v2319_v23  ;;  %1978 = vmatprep.mubr.msk.f32.mxu0 %vm105_vm13, %v2319_v23 }
  0xc3   :  { %2223 = vmatpush3.bf16.msra.mxu0 %v2518_v14  ;;  %2125 = vmatprep.subr.bf16.mxu1 %v2634_v58 }
  0xc4   :  { %1808 = vmatmul.mubr.msk.f32.gmra.mrb[10].mxu1 %vm104_vm10, %v2319_v23  ;;  %2225 = vmatprep.subr.bf16.mxu0 %v2535_v24 }
  0xc5   :  { %2127 = vmatpush3.bf16.msra.mxu1 %v2634_v58  ;;  %1979 = vmatmul.mubr.msk.f32.gmra.mrb[12].mxu0 %vm106_vm12, %v2319_v23 }
  0xc6   :  { %1810 = vmatprep.mubr.msk.f32.mxu1 %vm105_vm13, %v2319_v23  ;;  %1981 = vmatprep.mubr.msk.f32.mxu0 %vm107_vm15, %v2319_v23 }
  0xc7   :  { %2227 = vmatpush3.bf16.msra.mxu0 %v2535_v24  ;;  %2129 = vmatprep.subr.bf16.mxu1 %v2636_v48 }
  0xc8   :  { %1811 = vmatmul.mubr.msk.f32.gmra.mrb[12].mxu1 %vm106_vm12, %v2319_v23  ;;  %2229 = vmatprep.subr.bf16.mxu0 %v2570_v59 }
  0xc9   :  { %2131 = vmatpush3.bf16.msra.mxu1 %v2636_v48  ;;  %1982 = vmatmul.mubr.msk.f32.gmra.mrb[14].mxu0 %vm108_vm14, %v2319_v23 }
  0xca   :  { %1813 = vmatprep.mubr.msk.f32.mxu1 %vm107_vm15, %v2319_v23  ;;  %2016 = vmatprep.mubr.msk.f32.mxu0 %vm93_vm1, %v2319_v23 }
  0xcb   :  { %2231 = vmatpush3.bf16.msra.mxu0 %v2570_v59  ;;  %2133 = vmatprep.subr.bf16.mxu1 %v2638_v56 }
  0xcc   :  { %1814 = vmatmul.mubr.msk.f32.gmra.mrb[14].mxu1 %vm108_vm14, %v2319_v23 }
  0xcd   :  { %2135 = vmatpush3.bf16.msra.mxu1 %v2638_v56  ;;  %1848 = vmatprep.mubr.f32.mxu1 %v2660_v41 }
  0xce   :  { %2017 = vmatmul.mubr.msk.f32.vlgmr.msra.gmra.mrb[0].mxu0 %vm94_vm3, %v2319_v23 }
  0xcf   :  { %2019 = vmatprep.mubr.msk.f32.mxu0 %vm95_vm0, %v2319_v23  ;;  %vm1427_vm0 = vcmask 261120  }
  0xd0   :  { %1849 = vmatmul.mubr.f32.vlgmr.msra.gmra.mrb[0].mxu1 %v2682_v8 }
  0xd1   :  { %1851 = vmatprep.mubr.f32.mxu1 %v2658_v18 }
  0xd2   :  { %2020 = vmatmul.mubr.msk.f32.gmra.mrb[2].mxu0 %vm96_vm2, %v2319_v23 }
  0xd3   :  { %2022 = vmatprep.mubr.msk.f32.mxu0 %vm97_vm5, %v2319_v23 }
  0xd4   :  { %1852 = vmatmul.mubr.f32.gmra.mrb[2].mxu1 %v2680_v7 }
  0xd5   :  { %1854 = vmatprep.mubr.f32.mxu1 %v2706_v34 }
  0xd6   :  { %2023 = vmatmul.mubr.msk.f32.gmra.mrb[4].mxu0 %vm98_vm4, %v2319_v23 }
  0xd7   :  { %2025 = vmatprep.mubr.msk.f32.mxu0 %vm99_vm7, %v2319_v23 }
  0xd8   :  { %1855 = vmatmul.mubr.f32.gmra.mrb[4].mxu1 %v2704_v3 }
  0xd9   :  { %1857 = vmatprep.mubr.f32.mxu1 %v3184_v17 }
  0xda   :  { %2026 = vmatmul.mubr.msk.f32.gmra.mrb[6].mxu0 %vm100_vm6, %v2319_v23 }
  0xdb   :  { %2028 = vmatprep.mubr.msk.f32.mxu0 %vm101_vm9, %v2319_v23 }
  0xdc   :  { %1858 = vmatmul.mubr.f32.gmra.mrb[6].mxu1 %v3185_v20 }
  0xdd   :  { %1860 = vmatprep.mubr.f32.mxu1 %v3186_v27 }
  0xde   :  { %2029 = vmatmul.mubr.msk.f32.gmra.mrb[8].mxu0 %vm102_vm8, %v2319_v23 }
  0xdf   :  { %2031 = vmatprep.mubr.msk.f32.mxu0 %vm103_vm11, %v2319_v23 }
  0xe0   :  { %1861 = vmatmul.mubr.f32.gmra.mrb[8].mxu1 %v3187_v43 }
  0xe1   :  { %1863 = vmatprep.mubr.f32.mxu1 %v2788_v28 }
  0xe2   :  { %2032 = vmatmul.mubr.msk.f32.gmra.mrb[10].mxu0 %vm104_vm10, %v2319_v23 }
  0xe3   :  { %2034 = vmatprep.mubr.msk.f32.mxu0 %vm105_vm13, %v2319_v23 }
  0xe4   :  { %1864 = vmatmul.mubr.f32.gmra.mrb[10].mxu1 %v3188_v54 }
  0xe5   :  { %1866 = vmatprep.mubr.f32.mxu1 %v2816_v21 }
  0xe6   :  { %2035 = vmatmul.mubr.msk.f32.gmra.mrb[12].mxu0 %vm106_vm12, %v2319_v23 }
  0xe7   :  { %2037 = vmatprep.mubr.msk.f32.mxu0 %vm107_vm15, %v2319_v23 }
  0xe8   :  { %1867 = vmatmul.mubr.f32.gmra.mrb[12].mxu1 %v2814_v10 }
  0xe9   :  { %1869 = vmatprep.mubr.f32.mxu1 %v2844_v16 }
  0xea   :  { %2038 = vmatmul.mubr.msk.f32.gmra.mrb[14].mxu0 %vm108_vm14, %v2319_v23 }
  0xec   :  { %1870 = vmatmul.mubr.f32.gmra.mrb[14].mxu1 %v2842_v57 }
 0x1a1   :  { %v2018_v14 = vpop.f32.mrb[0].mxu0 }
 0x1a2   :  { %v1333_v24 = vpop.f32.mrb[1].mxu0 }
 0x1a3   :  { %v1850_v59 = vpop.f32.mrb[0].mxu1 }
 0x1a4   :  { %v2232_v35 = vadd.f32 %v2018_v14, %v1850_v59  ;;  %v723_v4 = vpop.f32.mrb[1].mxu1 }
 0x1a5   :  { %v2021_v37 = vpop.f32.mrb[2].mxu0  ;;  %v2233_v49 = vadd.f32 %v1333_v24, %v723_v4 }
 0x1a6   :  { %1429 = vst.msk [vmem:[%s3170_s2 + $0x8] sm:$0xff] %vm1427_vm0, %v2232_v35  ;;  %v1345_v51 = vpop.f32.mrb[3].mxu0 }
 0x1a7   :  { %1428 = vst.msk [vmem:[%s3170_s2] sm:$0xff] %vm1427_vm0, %v2233_v49  ;;  %v1853_v40 = vpop.f32.mrb[2].mxu1 }
 0x1a8   :  { %v2234_v52 = vadd.f32 %v2021_v37, %v1853_v40  ;;  %v737_v53 = vpop.f32.mrb[3].mxu1 }
 0x1a9   :  { %v2024_v58 = vpop.f32.mrb[4].mxu0  ;;  %v2235_v48 = vadd.f32 %v1345_v51, %v737_v53 }
 0x1aa   :  { %1431 = vst.msk [vmem:[%s3170_s2 + $0x18] sm:$0xff] %vm1427_vm0, %v2234_v52  ;;  %v1357_v56 = vpop.f32.mrb[5].mxu0 }
 0x1ab   :  { %1430 = vst.msk [vmem:[%s3170_s2 + $0x10] sm:$0xff] %vm1427_vm0, %v2235_v48  ;;  %v1856_v38 = vpop.f32.mrb[4].mxu1 }
 0x1ac   :  { %v2236_v39 = vadd.f32 %v2024_v58, %v1856_v38  ;;  %v751_v42 = vpop.f32.mrb[5].mxu1 }
 0x1ad   :  { %v2027_v18 = vpop.f32.mrb[6].mxu0  ;;  %v2237_v41 = vadd.f32 %v1357_v56, %v751_v42 }
 0x1ae   :  { %1433 = vst.msk [vmem:[%s3170_s2 + $0x28] sm:$0xff] %vm1427_vm0, %v2236_v39  ;;  %v1369_v50 = vpop.f32.mrb[7].mxu0 }
 0x1af   :  { %1432 = vst.msk [vmem:[%s3170_s2 + $0x20] sm:$0xff] %vm1427_vm0, %v2237_v41  ;;  %v1859_v31 = vpop.f32.mrb[6].mxu1 }
 0x1b0   :  { %v2238_v7 = vadd.f32 %v2027_v18, %v1859_v31  ;;  %v765_v8 = vpop.f32.mrb[7].mxu1 }
 0x1b1   :  { %v2030_v32 = vpop.f32.mrb[8].mxu0  ;;  %v2239_v45 = vadd.f32 %v1369_v50, %v765_v8 }
 0x1b2   :  { %1435 = vst.msk [vmem:[%s3170_s2 + $0x38] sm:$0xff] %vm1427_vm0, %v2238_v7  ;;  %v1381_v3 = vpop.f32.mrb[9].mxu0 }
 0x1b3   :  { %1434 = vst.msk [vmem:[%s3170_s2 + $0x30] sm:$0xff] %vm1427_vm0, %v2239_v45  ;;  %v1862_v34 = vpop.f32.mrb[8].mxu1 }
 0x1b4   :  { %v2240_v9 = vadd.f32 %v2030_v32, %v1862_v34  ;;  %v779_v15 = vpop.f32.mrb[9].mxu1 }
 0x1b5   :  { %v2033_v63 = vpop.f32.mrb[10].mxu0  ;;  %v2241_v12 = vadd.f32 %v1381_v3, %v779_v15 }
 0x1b6   :  { %1437 = vst.msk [vmem:[%s3170_s2 + $0x48] sm:$0xff] %vm1427_vm0, %v2240_v9  ;;  %v1393_v25 = vpop.f32.mrb[11].mxu0 }
 0x1b7   :  { %1436 = vst.msk [vmem:[%s3170_s2 + $0x40] sm:$0xff] %vm1427_vm0, %v2241_v12  ;;  %v1865_v22 = vpop.f32.mrb[10].mxu1 }
 0x1b8   :  { %v2242_v13 = vadd.f32 %v2033_v63, %v1865_v22  ;;  %v793_v29 = vpop.f32.mrb[11].mxu1 }
 0x1b9   :  { %v2036_v28 = vpop.f32.mrb[12].mxu0  ;;  %v2243_v36 = vadd.f32 %v1393_v25, %v793_v29 }
 0x1ba   :  { %1439 = vst.msk [vmem:[%s3170_s2 + $0x58] sm:$0xff] %vm1427_vm0, %v2242_v13  ;;  %v1405_v2 = vpop.f32.mrb[13].mxu0 }
 0x1bb   :  { %1438 = vst.msk [vmem:[%s3170_s2 + $0x50] sm:$0xff] %vm1427_vm0, %v2243_v36  ;;  %v1868_v19 = vpop.f32.mrb[12].mxu1 }
 0x1bc   :  { %v2244_v10 = vadd.f32 %v2036_v28, %v1868_v19  ;;  %v807_v21 = vpop.f32.mrb[13].mxu1 }
 0x1bd   :  { %v2039_v55 = vpop.f32.mrb[14].mxu0  ;;  %v2245_v1 = vadd.f32 %v1405_v2, %v807_v21 }
 0x1be   :  { %1441 = vst.msk [vmem:[%s3170_s2 + $0x68] sm:$0xff] %vm1427_vm0, %v2244_v10  ;;  %v1417_v30 = vpop.f32.mrb[15].mxu0 }
 0x1bf   :  { %1440 = vst.msk [vmem:[%s3170_s2 + $0x60] sm:$0xff] %vm1427_vm0, %v2245_v1  ;;  %v1871_v62 = vpop.f32.mrb[14].mxu1 }
 0x1c0   :  { %v2246_v46 = vadd.f32 %v2039_v55, %v1871_v62  ;;  %v821_v57 = vpop.f32.mrb[15].mxu1 }
 0x1c1   :  { %v2247_v16 = vadd.f32 %v1417_v30, %v821_v57 }
 0x1c2   :  { %1443 = vst.msk [vmem:[%s3170_s2 + $0x78] sm:$0xff] %vm1427_vm0, %v2246_v46 }
 0x1c3   :  { %1442 = vst.msk [vmem:[%s3170_s2 + $0x70] sm:$0xff] %vm1427_vm0, %v2247_v16 }

</bundles_post_ra>
